<compile_context>
chip_gen: v5e
topology: v5e:2x2
jax: 0.10.0
libtpu: 0.0.40
codegen_flags: <defaults>
</compile_context>

<pallas_src>
import functools

import jax
import jax.numpy as jnp
from jax.experimental import pallas as pl
from jax.experimental.pallas import tpu as pltpu


def _round_up(n, m):
    return ((n + m - 1) // m) * m


def _highway_kernel(x_ref, w_ref, b_ref, o_ref, *, single_col):
    """One (row-tile, col-tile) step of the highway forward.

    x_ref : [tm, Ep]      input row tile (native dtype)
    w_ref : [2, Ep, tn]   stacked [proj; gate] weight block (compute dtype)
    b_ref : [2, 1, tn]    stacked [proj; gate] bias block (f32)
    o_ref : [tm, tn]      output tile
    """
    tn = o_ref.shape[-1]

    x = x_ref[...]                         # native dtype (residual path)
    xc = x.astype(w_ref.dtype)             # bf16 (or f32) for the MXU

    proj = jnp.dot(xc, w_ref[0], preferred_element_type=jnp.float32) + b_ref[0]
    gate = jnp.dot(xc, w_ref[1], preferred_element_type=jnp.float32) + b_ref[1]
    proj = jnp.maximum(proj, 0.0)          # relu(x @ Wp + bp)
    gate = jax.nn.sigmoid(gate)            # sigmoid(x @ Wg + bg)

    if single_col:
        xs = x.astype(jnp.float32)         # tn == Ep: whole tile is residual
    else:
        col0 = pl.multiple_of(pl.program_id(1) * tn, 128)
        xs = x_ref[:, pl.ds(col0, tn)].astype(jnp.float32)

    # g*p + (1-g)*x  ==  x + g*(p - x)   (one fewer multiply)
    o_ref[...] = (xs + gate * (proj - xs)).astype(o_ref.dtype)


def prepare_highway_params(w_proj, b_proj, w_gate, b_gate, *, lane=128,
                           compute_dtype=jnp.bfloat16):
    """One-time weight prep (do this OUTSIDE the per-call forward).

    Transposes to x @ W layout, zero-pads the embed dim to a multiple of 128,
    stacks proj/gate into [2, Ep, Ep] (compute_dtype) and [2, 1, Ep] f32 bias.
    """
    e = w_proj.shape[0]
    ep = _round_up(e, lane)
    pad = ep - e
    wp_t = jnp.pad(w_proj.T, ((0, pad), (0, pad)))          # [Ep, Ep]
    wg_t = jnp.pad(w_gate.T, ((0, pad), (0, pad)))          # [Ep, Ep]
    w_stack = jnp.stack([wp_t, wg_t], axis=0).astype(compute_dtype)
    b_stack = jnp.stack(
        [jnp.pad(b_proj, (0, pad)), jnp.pad(b_gate, (0, pad))], axis=0
    ).reshape(2, 1, ep).astype(jnp.float32)
    return w_stack, b_stack


def highway_forward(x, w_stack, b_stack, *, tm=512, tn=None, min_row_tiles=4):
    """Highway forward.

    x       : [..., E]
    w_stack : [2, Ep, Ep]  stacked, pre-transposed weights (prepare_highway_params)
    b_stack : [2, 1, Ep]   stacked f32 biases
    """
    orig_shape = x.shape
    e = orig_shape[-1]
    two, ep, ep2 = w_stack.shape
    assert two == 2 and ep == ep2 and b_stack.shape == (2, 1, ep)

    x2d = x.reshape(-1, e)
    m = x2d.shape[0]

    itemsize = jnp.dtype(x.dtype).itemsize
    w_itemsize = jnp.dtype(w_stack.dtype).itemsize
    b_itemsize = jnp.dtype(b_stack.dtype).itemsize
    sub = max(8, 32 // itemsize)           # sublane multiple: 8 f32 / 16 bf16 / 32 i8

    # Row tile: big for HBM roofline, but keep >= min_row_tiles tiles so the
    # "parallel" row axis feeds both v7x TensorCores.  Everything stays a
    # multiple of the dtype sublane count.
    tm = max(sub, _round_up(tm, sub))
    tm_target = min(tm, _round_up(pl.cdiv(m, min_row_tiles), sub))
    tm_eff = max(sub, min(tm_target, _round_up(m, sub)))
    mp = _round_up(m, tm_eff)

    # Column tile over the embed dim: full Ep for typical sizes, tiled for
    # large E so resident-weight VMEM doesn't scale with Ep^2 (v7x: 64 MiB/TC).
    if tn is None:
        tn = ep if ep <= 1024 else 512
    assert ep % tn == 0 and tn % 128 == 0
    ncols = ep // tn

    # Zero-pad rows (ragged last tile) and lanes (E -> Ep, lane-dense stores).
    x_p = x2d
    if mp != m or ep != e:
        x_p = jnp.pad(x2d, ((0, mp - m), (0, ep - e)))

    grid = (mp // tm_eff, ncols)

    # VMEM budget: x/out tiles double-buffered, weight/bias blocks
    # (single-buffered when their block index is constant), f32 temporaries.
    w_bufs = 1 if ncols == 1 else 2
    vmem_bytes = (
        2 * tm_eff * ep * itemsize            # x row tile (double-buffered)
        + 2 * tm_eff * tn * itemsize          # out tile (double-buffered)
        + w_bufs * 2 * ep * tn * w_itemsize   # stacked weight block
        + w_bufs * 2 * tn * b_itemsize        # stacked bias block
        + tm_eff * ep * w_itemsize            # x cast to compute dtype
        + 6 * tm_eff * tn * 4                 # f32 proj/gate/xs/out temporaries
    )
    vmem_limit = max(32 << 20, min(64 << 20, int(vmem_bytes * 1.5) + (2 << 20)))

    cost = pl.CostEstimate(
        flops=2 * 2 * mp * ep * ep + 6 * mp * ep,
        transcendentals=mp * ep,                       # sigmoid
        bytes_accessed=(x_p.size + mp * ep) * itemsize
        + w_stack.size * w_itemsize + b_stack.size * b_itemsize,
    )

    kernel = functools.partial(_highway_kernel, single_col=(ncols == 1))

    def build(single_buffer_weights):
        w_kwargs = {}
        if single_buffer_weights:
            # Constant block index -> one buffer is enough; halves weight VMEM.
            w_kwargs = dict(pipeline_mode=pl.Buffered(1))
        in_specs = [
            # x row tile: reused across the inner column axis.
            # TODO(synk): sweep pl.Buffered(3) here if profiling shows exposed DMA.
            pl.BlockSpec((tm_eff, ep), lambda i, j: (i, 0)),
            pl.BlockSpec((2, ep, tn), lambda i, j: (0, 0, j), **w_kwargs),
            pl.BlockSpec((2, 1, tn), lambda i, j: (0, 0, j), **w_kwargs),
        ]
        return pl.pallas_call(
            kernel,
            out_shape=jax.ShapeDtypeStruct((mp, ep), x.dtype),
            grid_spec=pltpu.PrefetchScalarGridSpec(
                num_scalar_prefetch=0,
                grid=grid,
                in_specs=in_specs,
                out_specs=pl.BlockSpec((tm_eff, tn), lambda i, j: (i, j)),
            ),
            compiler_params=pltpu.CompilerParams(
                dimension_semantics=("parallel", "parallel"),
                vmem_limit_bytes=vmem_limit,
            ),
            cost_estimate=cost,
        )

    if ncols == 1:
        try:
            out2d = build(True)(x_p, w_stack, b_stack)
        except Exception:
            # Fallback if this jax build rejects single-buffered BlockSpecs.
            out2d = build(False)(x_p, w_stack, b_stack)
    else:
        out2d = build(False)(x_p, w_stack, b_stack)

    return out2d[:m, :e].reshape(orig_shape)


def _init_linear_params(key, embed_size):
    """Deterministic init mimicking nn.Linear default (uniform +/- 1/sqrt(fan_in))."""
    kw, kb = jax.random.split(key)
    bound = 1.0 / jnp.sqrt(embed_size)
    w = jax.random.uniform(kw, (embed_size, embed_size), jnp.float32, -bound, bound)
    b = jax.random.uniform(kb, (embed_size,), jnp.float32, -bound, bound)
    return w, b


def _reference(x, w_proj, b_proj, w_gate, b_gate):
    """Pure-JAX reference of the PyTorch forward, for correctness checking."""
    x_proj = jnp.maximum(x @ w_proj.T + b_proj, 0.0)
    x_gate = jax.nn.sigmoid(x @ w_gate.T + b_gate)
    return x_gate * x_proj + (1.0 - x_gate) * x


if __name__ == "__main__":
    key = jax.random.PRNGKey(0)
    k_x, k_proj, k_gate = jax.random.split(key, 3)

    batch, seq, embed_size = 2, 8, 32

    x = jax.random.normal(k_x, (batch, seq, embed_size), jnp.float32)
    w_proj, b_proj = _init_linear_params(k_proj, embed_size)
    w_gate, b_gate = _init_linear_params(k_gate, embed_size)

    ref = _reference(x, w_proj, b_proj, w_gate, b_gate)

    # Full-precision path: must match the reference tightly.
    w_f32, b_f32 = prepare_highway_params(
        w_proj, b_proj, w_gate, b_gate, compute_dtype=jnp.float32)
    out_f32 = jax.block_until_ready(highway_forward(x, w_f32, b_f32))
    assert out_f32.shape == x.shape
    assert jnp.allclose(out_f32, ref, atol=1e-5, rtol=1e-5), "f32 path mismatch"

    # Default bf16-matmul path (MXU-native): usual bf16-GEMM tolerance.
    w_bf16, b_bf16 = prepare_highway_params(w_proj, b_proj, w_gate, b_gate)
    out_bf16 = jax.block_until_ready(highway_forward(x, w_bf16, b_bf16))
    assert out_bf16.shape == x.shape
    assert jnp.allclose(out_bf16, ref, atol=3e-2, rtol=3e-2), "bf16 path mismatch"

    print("KERNEL_OK")
</pallas_src>

<mosaic_0001>
module attributes {stable_mosaic.version = 11 : i64} {
  func.func @_highway_kernel(%arg0: i32, %arg1: i32, %arg2: memref<8x128xf32, #tpu.memory_space<vmem>>, %arg3: memref<2x128x128xf32, #tpu.memory_space<vmem>>, %arg4: memref<2x1x128xf32, #tpu.memory_space<vmem>>, %arg5: memref<8x128xf32, #tpu.memory_space<vmem>>) attributes {dimension_semantics = [#tpu.dimension_semantics<parallel>, #tpu.dimension_semantics<parallel>], iteration_bounds = array<i64: 2, 1>, scalar_prefetch = 0 : i64, scratch_operands = 0 : i64, tpu.core_type = #tpu.core_type<tc>, window_params = [{transform_indices = @transform_0, window_bounds = array<i64: 8, 128>}, {pipeline_mode = #tpu.pipeline_mode<synchronous>, transform_indices = @transform_1, window_bounds = array<i64: 2, 128, 128>}, {pipeline_mode = #tpu.pipeline_mode<synchronous>, transform_indices = @transform_2, window_bounds = array<i64: 2, 1, 128>}, {transform_indices = @transform_3, window_bounds = array<i64: 8, 128>}]} {
    %c0 = arith.constant 0 : index
    %c0_0 = arith.constant 0 : index
    %0 = vector.load %arg2[%c0, %c0_0] : memref<8x128xf32, #tpu.memory_space<vmem>>, vector<8x128xf32>
    %c0_1 = arith.constant 0 : index
    %c0_2 = arith.constant 0 : index
    %c0_3 = arith.constant 0 : index
    %1 = vector.load %arg3[%c0_1, %c0_2, %c0_3] : memref<2x128x128xf32, #tpu.memory_space<vmem>>, vector<1x128x128xf32>
    %2 = vector.shape_cast %1 : vector<1x128x128xf32> to vector<128x128xf32>
    %cst = arith.constant dense<0.000000e+00> : vector<8x128xf32>
    %3 = tpu.matmul %0, %2, %cst {dimension_numbers = #tpu.dot_dimension_numbers<[1], [0], [0], [1], [0, 0, 1, 1], [], []>} : vector<8x128xf32>, vector<128x128xf32>, vector<8x128xf32> -> vector<8x128xf32>
    %c0_4 = arith.constant 0 : index
    %c0_5 = arith.constant 0 : index
    %c0_6 = arith.constant 0 : index
    %4 = vector.load %arg4[%c0_4, %c0_5, %c0_6] : memref<2x1x128xf32, #tpu.memory_space<vmem>>, vector<1x1x128xf32>
    %5 = vector.shape_cast %4 : vector<1x1x128xf32> to vector<1x128xf32>
    %6 = vector.broadcast %5 : vector<1x128xf32> to vector<8x128xf32>
    %7 = arith.addf %3, %6 : vector<8x128xf32>
    %c1 = arith.constant 1 : index
    %c0_7 = arith.constant 0 : index
    %c0_8 = arith.constant 0 : index
    %8 = vector.load %arg3[%c1, %c0_7, %c0_8] : memref<2x128x128xf32, #tpu.memory_space<vmem>>, vector<1x128x128xf32>
    %9 = vector.shape_cast %8 : vector<1x128x128xf32> to vector<128x128xf32>
    %cst_9 = arith.constant dense<0.000000e+00> : vector<8x128xf32>
    %10 = tpu.matmul %0, %9, %cst_9 {dimension_numbers = #tpu.dot_dimension_numbers<[1], [0], [0], [1], [0, 0, 1, 1], [], []>} : vector<8x128xf32>, vector<128x128xf32>, vector<8x128xf32> -> vector<8x128xf32>
    %c1_10 = arith.constant 1 : index
    %c0_11 = arith.constant 0 : index
    %c0_12 = arith.constant 0 : index
    %11 = vector.load %arg4[%c1_10, %c0_11, %c0_12] : memref<2x1x128xf32, #tpu.memory_space<vmem>>, vector<1x1x128xf32>
    %12 = vector.shape_cast %11 : vector<1x1x128xf32> to vector<1x128xf32>
    %13 = vector.broadcast %12 : vector<1x128xf32> to vector<8x128xf32>
    %14 = arith.addf %10, %13 : vector<8x128xf32>
    %cst_13 = arith.constant 0.000000e+00 : f32
    %15 = vector.broadcast %cst_13 : f32 to vector<8x128xf32>
    %16 = arith.maximumf %7, %15 : vector<8x128xf32>
    %17 = arith.negf %14 : vector<8x128xf32>
    %18 = math.exp %17 : vector<8x128xf32>
    %cst_14 = arith.constant 1.000000e+00 : f32
    %19 = vector.broadcast %cst_14 : f32 to vector<8x128xf32>
    %20 = arith.addf %19, %18 : vector<8x128xf32>
    %21 = arith.divf %19, %20 : vector<8x128xf32>
    %22 = arith.subf %16, %0 : vector<8x128xf32>
    %23 = arith.mulf %21, %22 : vector<8x128xf32>
    %24 = arith.addf %0, %23 : vector<8x128xf32>
    %c0_15 = arith.constant 0 : index
    %c0_16 = arith.constant 0 : index
    %25 = vector.load %arg5[%c0_15, %c0_16] : memref<8x128xf32, #tpu.memory_space<vmem>>, vector<8x128xf32>
    tpu.vector_store %arg5[%c0_15, %c0_16], %24 {strides = array<i32>} : memref<8x128xf32, #tpu.memory_space<vmem>>, vector<8x128xf32>,
    return
  }
  func.func @transform_0(%arg0: i32, %arg1: i32) -> (i32, i32) {
    %c0_i32 = arith.constant 0 : i32
    %c0_i32_0 = arith.constant 0 : i32
    return %arg0, %c0_i32 : i32, i32
  }
  func.func @transform_1(%arg0: i32, %arg1: i32) -> (i32, i32, i32) {
    %c0_i32 = arith.constant 0 : i32
    %c0_i32_0 = arith.constant 0 : i32
    %c0_i32_1 = arith.constant 0 : i32
    return %c0_i32, %c0_i32_0, %arg1 : i32, i32, i32
  }
  func.func @transform_2(%arg0: i32, %arg1: i32) -> (i32, i32, i32) {
    %c0_i32 = arith.constant 0 : i32
    %c0_i32_0 = arith.constant 0 : i32
    %c0_i32_1 = arith.constant 0 : i32
    return %c0_i32, %c0_i32_0, %arg1 : i32, i32, i32
  }
  func.func @transform_3(%arg0: i32, %arg1: i32) -> (i32, i32) {
    %c0_i32 = arith.constant 0 : i32
    return %arg0, %arg1 : i32, i32
  }
}

module attributes {stable_mosaic.version = 11 : i64} {
  func.func @_highway_kernel(%arg0: i32, %arg1: i32, %arg2: memref<8x128xf32, #tpu.memory_space<vmem>>, %arg3: memref<2x128x128xf32, #tpu.memory_space<vmem>>, %arg4: memref<2x1x128xf32, #tpu.memory_space<vmem>>, %arg5: memref<8x128xf32, #tpu.memory_space<vmem>>) attributes {dimension_semantics = [#tpu.dimension_semantics<parallel>, #tpu.dimension_semantics<parallel>], iteration_bounds = array<i64: 2, 1>, scalar_prefetch = 0 : i64, scratch_operands = 0 : i64, tpu.core_type = #tpu.core_type<tc>, window_params = [{transform_indices = @transform_0, window_bounds = array<i64: 8, 128>}, {transform_indices = @transform_1, window_bounds = array<i64: 2, 128, 128>}, {transform_indices = @transform_2, window_bounds = array<i64: 2, 1, 128>}, {transform_indices = @transform_3, window_bounds = array<i64: 8, 128>}]} {
    %c0 = arith.constant 0 : index
    %c0_0 = arith.constant 0 : index
    %0 = vector.load %arg2[%c0, %c0_0] : memref<8x128xf32, #tpu.memory_space<vmem>>, vector<8x128xf32>
    %c0_1 = arith.constant 0 : index
    %c0_2 = arith.constant 0 : index
    %c0_3 = arith.constant 0 : index
    %1 = vector.load %arg3[%c0_1, %c0_2, %c0_3] : memref<2x128x128xf32, #tpu.memory_space<vmem>>, vector<1x128x128xf32>
    %2 = vector.shape_cast %1 : vector<1x128x128xf32> to vector<128x128xf32>
    %cst = arith.constant dense<0.000000e+00> : vector<8x128xf32>
    %3 = tpu.matmul %0, %2, %cst {dimension_numbers = #tpu.dot_dimension_numbers<[1], [0], [0], [1], [0, 0, 1, 1], [], []>} : vector<8x128xf32>, vector<128x128xf32>, vector<8x128xf32> -> vector<8x128xf32>
    %c0_4 = arith.constant 0 : index
    %c0_5 = arith.constant 0 : index
    %c0_6 = arith.constant 0 : index
    %4 = vector.load %arg4[%c0_4, %c0_5, %c0_6] : memref<2x1x128xf32, #tpu.memory_space<vmem>>, vector<1x1x128xf32>
    %5 = vector.shape_cast %4 : vector<1x1x128xf32> to vector<1x128xf32>
    %6 = vector.broadcast %5 : vector<1x128xf32> to vector<8x128xf32>
    %7 = arith.addf %3, %6 : vector<8x128xf32>
    %c1 = arith.constant 1 : index
    %c0_7 = arith.constant 0 : index
    %c0_8 = arith.constant 0 : index
    %8 = vector.load %arg3[%c1, %c0_7, %c0_8] : memref<2x128x128xf32, #tpu.memory_space<vmem>>, vector<1x128x128xf32>
    %9 = vector.shape_cast %8 : vector<1x128x128xf32> to vector<128x128xf32>
    %cst_9 = arith.constant dense<0.000000e+00> : vector<8x128xf32>
    %10 = tpu.matmul %0, %9, %cst_9 {dimension_numbers = #tpu.dot_dimension_numbers<[1], [0], [0], [1], [0, 0, 1, 1], [], []>} : vector<8x128xf32>, vector<128x128xf32>, vector<8x128xf32> -> vector<8x128xf32>
    %c1_10 = arith.constant 1 : index
    %c0_11 = arith.constant 0 : index
    %c0_12 = arith.constant 0 : index
    %11 = vector.load %arg4[%c1_10, %c0_11, %c0_12] : memref<2x1x128xf32, #tpu.memory_space<vmem>>, vector<1x1x128xf32>
    %12 = vector.shape_cast %11 : vector<1x1x128xf32> to vector<1x128xf32>
    %13 = vector.broadcast %12 : vector<1x128xf32> to vector<8x128xf32>
    %14 = arith.addf %10, %13 : vector<8x128xf32>
    %cst_13 = arith.constant 0.000000e+00 : f32
    %15 = vector.broadcast %cst_13 : f32 to vector<8x128xf32>
    %16 = arith.maximumf %7, %15 : vector<8x128xf32>
    %17 = arith.negf %14 : vector<8x128xf32>
    %18 = math.exp %17 : vector<8x128xf32>
    %cst_14 = arith.constant 1.000000e+00 : f32
    %19 = vector.broadcast %cst_14 : f32 to vector<8x128xf32>
    %20 = arith.addf %19, %18 : vector<8x128xf32>
    %21 = arith.divf %19, %20 : vector<8x128xf32>
    %22 = arith.subf %16, %0 : vector<8x128xf32>
    %23 = arith.mulf %21, %22 : vector<8x128xf32>
    %24 = arith.addf %0, %23 : vector<8x128xf32>
    %c0_15 = arith.constant 0 : index
    %c0_16 = arith.constant 0 : index
    %25 = vector.load %arg5[%c0_15, %c0_16] : memref<8x128xf32, #tpu.memory_space<vmem>>, vector<8x128xf32>
    tpu.vector_store %arg5[%c0_15, %c0_16], %24 {strides = array<i32>} : memref<8x128xf32, #tpu.memory_space<vmem>>, vector<8x128xf32>,
    return
  }
  func.func @transform_0(%arg0: i32, %arg1: i32) -> (i32, i32) {
    %c0_i32 = arith.constant 0 : i32
    %c0_i32_0 = arith.constant 0 : i32
    return %arg0, %c0_i32 : i32, i32
  }
  func.func @transform_1(%arg0: i32, %arg1: i32) -> (i32, i32, i32) {
    %c0_i32 = arith.constant 0 : i32
    %c0_i32_0 = arith.constant 0 : i32
    %c0_i32_1 = arith.constant 0 : i32
    return %c0_i32, %c0_i32_0, %arg1 : i32, i32, i32
  }
  func.func @transform_2(%arg0: i32, %arg1: i32) -> (i32, i32, i32) {
    %c0_i32 = arith.constant 0 : i32
    %c0_i32_0 = arith.constant 0 : i32
    %c0_i32_1 = arith.constant 0 : i32
    return %c0_i32, %c0_i32_0, %arg1 : i32, i32, i32
  }
  func.func @transform_3(%arg0: i32, %arg1: i32) -> (i32, i32) {
    %c0_i32 = arith.constant 0 : i32
    return %arg0, %arg1 : i32, i32
  }
}

</mosaic_0001>

<bundles_post_ra>
// kernel: tpu_custom_call.1
= control target key start
LH: loop header
LB: loop body
LE: loop exit
PB: predicated region body
PF: predicated region fallthrough
CT: control target
= control target key end

     0   :  { %8 = vsyncpa [#allocation3], 0  ;;  %s939_s0 = inlined_call_operand.hbm [shape: f32[16,128], index: 0, kind: input, shape index: {}]   ;;  %s940_s1 = inlined_call_operand.hbm [shape: f32[2,128,128], index: 1, kind: input, shape index: {}]   ;;  %s941_s2 = inlined_call_operand.hbm [shape: f32[2,1,128], index: 2, kind: input, shape index: {}]   ;;  %s942_s3 = inlined_call_operand.hbm [shape: f32[16,128], index: 3, kind: output, shape index: {}]  }
   0x1   :  { %10 = vsyncpa [#allocation3 + $0x1], 0 }
   0x2   :  { %11 = vsyncpa [#allocation6], 0 }
   0x3   :  { %12 = vsyncpa [#allocation4], 0 }
   0x4   :  { %14 = vsyncpa [#allocation4 + $0x1], 0  ;;  %s788_s12 = smov 0   ;;  %s790_s13 = smov 0  }
   0x5   :  { %s792_s14 = smov 0   ;;  %s794_s15 = smov 0  }
   0x6   :  { %s796_s16 = smov 0   ;;  %s798_s17 = smov 0  }
   0x7 LB: > { %s473_s18 = sadd.s32 4294967295, %s760_s17   ;;  %p475_p0 = scmp.ge.s32.totalorder %s760_s17, 1  ;;  %s760_s17 = sphi %s798_s17, %s20_s17   ;;  %s756_s16 = sphi %s796_s16, %s952_s16   ;;  %s752_s15 = sphi %s794_s15, %s951_s15   ;;  %s748_s14 = sphi %s792_s14, %s950_s14   ;;  %s744_s13 = sphi %s790_s13, %s949_s13   ;;  %s740_s12 = sphi %s788_s12, %s948_s12  }
   0x8   : > { %p822_p1 = scmp.eq.s32.totalorder %s473_s18, 0  ;;  %p143_p2 = scmp.lt.s32.totalorder %s760_s17, 3 }
   0x9   : > { %s156_s22 = sshll.u32 %s940_s1, 4  ;;  %s762_s24 = smov [#allocation5]   ;;  %s157_s22 = int_to_ptr.hbm [resolvable:$true] %s156_s22 }
   0xa   : > { %p830_p3 = pnand %p475_p0, %p143_p2  ;;  %s158_s25 = sshll.u32 %s762_s24, 4  ;;  %s159_s25 = int_to_ptr.vmem [resolvable:$true] %s158_s25 }
   0xb   : > { %p478_p6 = scmp.ge.s32.totalorder %s760_s17, 2  ;;  %s171_s28 = sshll.u32 %s941_s2, 4  ;;  %s172_s28 = int_to_ptr.hbm [resolvable:$true] %s171_s28 }
   0xc   : > { %p503_p4 = pneg %p830_p3  ;;  %s763_s29 = smov 128  }
   0xd   : > { %s764_s30 = smov 8   ;;  %s765_s4 = smov [#allocation7]  }
   0xe   : > { %p504_p5 = pnand %p503_p4, %p822_p1  ;;  %s173_s5 = sshll.u32 %s765_s4, 4  ;;  %s174_s5 = int_to_ptr.vmem [resolvable:$true] %s173_s5 }
   0xf   : > { %s766_s6 = smov 16   ;;  %s767_s7 = smov 1  }
  0x10   : > { %506 = dma.hbm_to_vmem [thread:$0]  (!%p504_p5), %s157_s22, 4096, %s159_s25, [#allocation6], %s763_s29, %s763_s29, %s764_s30  }
  0x11   : > { %509 = dma.hbm_to_vmem [thread:$0]  (!%p504_p5), %s172_s28, 32, %s174_s5, [#allocation6], %s766_s6, %s766_s6, %s767_s7  }
  0x12   : > { %s32_s8 = sadd.s32 1, %s756_s16  ;;  %s474_s9 = sadd.s32 4294967294, %s760_s17  }
  0x13   : > { %p34_p7 = scmp.ge.s32.totalorder %s32_s8, 2  ;;  %s39_s10 = sadd.s32 1, %s748_s14 }
  0x14   : > { %p46_p8 = scmp.ne.s32.totalorder %s748_s14, %s744_s13  ;;  %p47_p9 = scmp.eq.s32.totalorder %s760_s17, 0 }
  0x15   : > { %s954_s8 = smov (%p34_p7, %s32_s8), 0  ;;  %p52_p10 = scmp.ne.s32.totalorder %s744_s13, %s740_s12 }
  0x16   : > { %s36_s11 = ssub.s32 %s756_s16, %s954_s8  ;;  %p130_p11 = scmp.eq.s32.totalorder %s473_s18, 1 }
  0x17   : > { %p37_p12 = scmp.eq.s32.totalorder %s36_s11, 0  ;;  %p858_p13 = por %p822_p1, %p52_p10 }
  0x18   : > { %p862_p0 = por %p130_p11, %p46_p8  ;;  %p136_p2 = scmp.eq.s32.totalorder %s474_s9, 1 }
  0x19   : > { %s867_s22 = scalar_select %p37_p12, %s748_s14, %s39_s10  }
  0x1a   : > { %p48_p4 = por %p47_p9, %p46_p8  ;;  %p869_p5 = por %p136_p2, %p52_p10 }
  0x1b   : > { %s187_s25 = sand.u32 1, %s748_s14   ;;  %s480_s18 = sshll.u32 %s756_s16, 3 }
  0x1c   : > { %p520_p7 = scmp.lt.s32.totalorder %s760_s17, 2  ;;  %s479_s26 = sshll.u32 %s187_s25, 3 }
  0x1d   : > { %s195_s29 = scalar_lea.hbm %s939_s0, %s480_s18  ;;  %s191_s4 = scalar_lea.vmem [#allocation2], %s479_s26 }
  0x1e   : > { %s197_s30 = sshll.u32 %s195_s29, 4  ;;  %s199_s5 = sshll.u32 %s191_s4, 4  ;;  %s198_s30 = int_to_ptr.hbm [resolvable:$true] %s197_s30  ;;  %s200_s5 = int_to_ptr.vmem [resolvable:$true] %s199_s5 }
  0x1f   : > { %p511_p11 = pnand %p520_p7, %p48_p4  ;;  %s188_s6 = scalar_lea.sflag [#allocation3], %s187_s25 }
  0x20   : > { %208 = sbr.rel (%p830_p3) target bundleno = 235 (0xeb), region = 32  ;;  %s882_s7 = sand.u32 (!%p830_p3), 1, %s744_s13  }
  0x21   : > { %513 = dma.hbm_to_vmem [thread:$0]  (!%p511_p11), %s198_s30, 128, %s200_s5, %s188_s6  }
  0x22   : > { %s482_s9 = sshll.u32 (!%p830_p3), %s882_s7, 3  ;;  %s211_s10 = scalar_lea.sflag (!%p830_p3), [#allocation3], %s882_s7 }
  0x23   : > { %s888_s11 = scalar_lea.vmem (!%p830_p3), [#allocation2], %s482_s9 }
  0x25   : > { %727 = dma.done.wait (%p858_p13), %s211_s10, 128  }
  0x26   : > { %729 = vsyncadd (%p858_p13), %s211_s10, 4294967168 }
  0x27   : > { %731 = dma.done.wait (%p822_p1), [#allocation6], 4128  }
  0x28   : > { %733 = vsyncadd (%p822_p1), [#allocation6], 4294963168  ;;  %v305_v0 = vld [vmem:[#allocation5 + $0xf8] sm:$0xff]  ;;  %v304_v1 = vld [vmem:[#allocation5 + $0xf0] sm:$0xff]  ;;  %s488_s19 = sshll.u32 %s752_s15, 3  ;;  %s247_s18 = scalar_lea.vmem [#allocation8], %s482_s9 }
  0x29   : > { %311 = vmatpush.msra.mxu1 %v305_v0  ;;  %v303_v2 = vld [vmem:[#allocation5 + $0xe8] sm:$0xff]  ;;  %v302_v3 = vld [vmem:[#allocation5 + $0xe0] sm:$0xff]  ;;  %v264_v4 = vld [vmem:[#allocation5 + $0x78] sm:$0xff]  ;;  %s367_s25 = scalar_lea.hbm %s942_s3, %s488_s19  ;;  %s369_s15 = sshll.u32 %s247_s18, 4  ;;  %s370_s15 = int_to_ptr.vmem [resolvable:$true] %s369_s15 }
  0x2a   : > { %v263_v5 = vld [vmem:[#allocation5 + $0x70] sm:$0xff]  ;;  %269 = vmatpush.msra.mxu0 %v264_v4  ;;  %v301_v6 = vld [vmem:[#allocation5 + $0xd8] sm:$0xff]  ;;  %v262_v7 = vld [vmem:[#allocation5 + $0x68] sm:$0xff]  ;;  %s371_s26 = sshll.u32 %s367_s25, 4  ;;  %s356_s27 = scalar_lea.sflag [#allocation4], %s882_s7  ;;  %s372_s26 = int_to_ptr.hbm [resolvable:$true] %s371_s26 }
  0x2b   : > { %312 = vmatpush.msra.mxu1 %v304_v1  ;;  %v300_v8 = vld [vmem:[#allocation5 + $0xd0] sm:$0xff]  ;;  %v261_v9 = vld [vmem:[#allocation5 + $0x60] sm:$0xff]  ;;  %v299_v10 = vld [vmem:[#allocation5 + $0xc8] sm:$0xff]  ;;  %s688_s28 = sshra.s32 %s372_s26, 4  ;;  %s694_s5 = scalar_lea.hbm %s942_s3, 16  ;;  %s689_s28 = int_to_ptr.hbm [resolvable:$true] %s688_s28 }
  0x2c   : > { %270 = vmatpush.msra.mxu0 %v263_v5  ;;  %v260_v11 = vld [vmem:[#allocation5 + $0x58] sm:$0xff]  ;;  %v298_v12 = vld [vmem:[#allocation5 + $0xc0] sm:$0xff]  ;;  %v259_v13 = vld [vmem:[#allocation5 + $0x50] sm:$0xff]  ;;  %s690_s29 = scalar_lea.hbm %s689_s28, 8  ;;  %p695_p9 = scmp.lt.s32.totalorder %s689_s28, %s942_s3 }
  0x2d   : > { %313 = vmatpush.msra.mxu1 %v303_v2  ;;  %v297_v14 = vld [vmem:[#allocation5 + $0xb8] sm:$0xff]  ;;  %v258_v15 = vld [vmem:[#allocation5 + $0x48] sm:$0xff]  ;;  %v296_v16 = vld [vmem:[#allocation5 + $0xb0] sm:$0xff]  ;;  %p691_p1 = scmp.ne.s32.totalorder %s689_s28, %s690_s29  ;;  %p696_p10 = scmp.lt.s32.totalorder %s694_s5, %s690_s29 }
  0x2e   : > { %271 = vmatpush.msra.mxu0 %v262_v7  ;;  %v257_v17 = vld [vmem:[#allocation5 + $0x40] sm:$0xff]  ;;  %v295_v18 = vld [vmem:[#allocation5 + $0xa8] sm:$0xff]  ;;  %v256_v19 = vld [vmem:[#allocation5 + $0x38] sm:$0xff] }
  0x2f   : > { %314 = vmatpush.msra.mxu1 %v302_v3  ;;  %v294_v20 = vld [vmem:[#allocation5 + $0xa0] sm:$0xff]  ;;  %v255_v21 = vld [vmem:[#allocation5 + $0x30] sm:$0xff]  ;;  %v293_v22 = vld [vmem:[#allocation5 + $0x98] sm:$0xff]  ;;  %p692_p3 = pnand %p691_p1, %p862_p0  ;;  %p697_p12 = por %p696_p10, %p695_p9 }
  0x30   : > { %272 = vmatpush.msra.mxu0 %v261_v9  ;;  %v254_v23 = vld [vmem:[#allocation5 + $0x28] sm:$0xff]  ;;  %v292_v24 = vld [vmem:[#allocation5 + $0x90] sm:$0xff]  ;;  %v253_v25 = vld [vmem:[#allocation5 + $0x20] sm:$0xff] }
  0x31   : > { %315 = vmatpush.msra.mxu1 %v301_v6  ;;  %v291_v26 = vld [vmem:[#allocation5 + $0x88] sm:$0xff]  ;;  %v252_v27 = vld [vmem:[#allocation5 + $0x18] sm:$0xff]  ;;  %v290_v28 = vld [vmem:[#allocation5 + $0x80] sm:$0xff]  ;;  %p693_p8 = pneg %p692_p3 }
  0x32   : > { %273 = vmatpush.msra.mxu0 %v260_v11  ;;  %v251_v29 = vld [vmem:[#allocation5 + $0x10] sm:$0xff]  ;;  %v250_v31 = vld [vmem:[#allocation5 + $0x8] sm:$0xff]  ;;  %v249_v32 = vld [vmem:[#allocation5] sm:$0xff] }
  0x33   : > { %316 = vmatpush.msra.mxu1 %v300_v8  ;;  %v248_v30 = vld [vmem:[%s888_s11] sm:$0xff]  ;;  %v578_v33 = vld [vmem:[#allocation7 + $0x1] ss:$0 sm:$0xff]  ;;  %v579_v39 = vld [vmem:[#allocation7] ss:$0 sm:$0xff]  ;;  %p698_p13 = pnand %p697_p12, %p693_p8 }
  0x34   : > { %274 = vmatpush.msra.mxu0 %v259_v13 }
  0x35   : > { %317 = vmatpush.msra.mxu1 %v299_v10 }
  0x36   : > { %275 = vmatpush.msra.mxu0 %v258_v15 }
  0x37   : > { %318 = vmatpush.msra.mxu1 %v298_v12 }
  0x38   : > { %276 = vmatpush.msra.mxu0 %v257_v17 }
  0x39   : > { %319 = vmatpush.msra.mxu1 %v297_v14 }
  0x3a   : > { %277 = vmatpush.msra.mxu0 %v256_v19 }
  0x3b   : > { %320 = vmatpush.msra.mxu1 %v296_v16 }
  0x3c   : > { %278 = vmatpush.msra.mxu0 %v255_v21 }
  0x3d   : > { %321 = vmatpush.msra.mxu1 %v295_v18 }
  0x3e   : > { %279 = vmatpush.msra.mxu0 %v254_v23 }
  0x3f   : > { %322 = vmatpush.msra.mxu1 %v294_v20 }
  0x40   : > { %280 = vmatpush.msra.mxu0 %v253_v25 }
  0x41   : > { %323 = vmatpush.msra.mxu1 %v293_v22 }
  0x42   : > { %281 = vmatpush.msra.mxu0 %v252_v27 }
  0x43   : > { %324 = vmatpush.msra.mxu1 %v292_v24 }
  0x44   : > { %282 = vmatpush.msra.mxu0 %v251_v29 }
  0x45   : > { %325 = vmatpush.msra.mxu1 %v291_v26 }
  0x46   : > { %283 = vmatpush.msra.mxu0 %v250_v31 }
  0x47   : > { %326 = vmatpush.msra.mxu1 %v290_v28 }
  0x48   : > { %327 = vmatmul.f32.vlgmr.msra.gmra.mxu1 %v248_v30  ;;  %284 = vmatpush.msra.mxu0 %v249_v32 }
  0x49   : > { %285 = vmatmul.f32.vlgmr.msra.gmra.mxu0 %v248_v30 }
  0xc5   : > { %v328_v34 = vpop.f32.mrf.mxu1 }
  0xc6   : > { %v329_v35 = vadd.f32 %v578_v33, %v328_v34  ;;  %v286_v40 = vpop.f32.mrf.mxu0 }
  0xc7   : > { %v287_v41 = vadd.f32 %v579_v39, %v286_v40 }
  0xc8   : > { %v486_v36 = vmul.f32 -1.442695, %v329_v35 }
  0xc9   : > { %v331_v45 = vmax.f32 %v287_v41, 0.0 }
  0xca   : > { %580 = vpow2.f32 %v486_v36 }
  0xcb   : > { %v351_v50 = vsub.f32 %v331_v45, %v248_v30 }
  0xd0   : > { %v581_v37 = vpop.eup %580 }
  0xd1   : > { %v335_v38 = vadd.f32 1.0, %v581_v37 }
  0xd3   : > { %582 = vrcp.f32 %v335_v38  ;;  %v347_v46 = vand.u32 2147483648, %v335_v38  ;;  %v345_v48 = vand.u32 2147483647, %v335_v38  ;;  %vm341_vm1 = vweird.f32 %v335_v38 }
  0xd5   : > { %v348_v51 = vor.u32 1.1754944e-38, %v347_v46  ;;  %vm346_vm3 = vcmp.eq.f32.partialorder %v345_v48, 8.507059e+37 }
  0xd9   : > { %v583_v42 = vpop.eup %582 }
  0xda   : > { %v337_v43 = vmul.f32 %v583_v42, %v335_v38  ;;  %vm342_vm0 = vweird.f32 %v583_v42 }
  0xdb   : > { %vm343_vm2 = vmor %vm341_vm1, %vm342_vm0 }
  0xdc   : > { %v338_v44 = vsub.f32 1.0, %v337_v43 }
  0xde   : > { %v339_v47 = vmul.f32 %v583_v42, %v338_v44 }
  0xe0   : > { %v340_v49 = vadd.f32 %v583_v42, %v339_v47 }
  0xe2   : > { %v344_v52 = vsel %vm343_vm2, %v583_v42, %v340_v49 }
  0xe3   : > { %v349_v53 = vsel %vm346_vm3, %v348_v51, %v344_v52 }
  0xe4   : > { %v352_v54 = vmul.f32 %v351_v50, %v349_v53 }
  0xe6   : > { %v353_v55 = vadd.f32 %v352_v54, %v248_v30 }
  0xe8   : > { %354 = vst [vmem:[%s247_s18] sm:$0xff] %v353_v55 }
  0xe9   : > { %701 = shalt.err (!%p698_p13)
}
  0xea   : > { %501 = dma.vmem_to_hbm [thread:$0]  (%p862_p0), %s370_s15, 128, %s372_s26, %s356_s27  }
  0xeb PF: > { %s383_s7 = sand.u32 1, %s740_s12   ;;  %p515_p2 = pnand %p478_p6, %p869_p5 }
  0xec   : > { %s384_s10 = scalar_lea.sflag [#allocation4], %s383_s7 }
  0xed   : > { %p516_p4 = pneg %p515_p2 }
  0xef   : > { %735 = dma.done.wait (%p516_p4), %s384_s10, 128  }
  0xf0   : > { %737 = vsyncadd (%p516_p4), %s384_s10, 4294967168  ;;  %s20_s17 = sadd.s32 1, %s760_s17   ;;  %s948_s12 = smov %s744_s13 }
  0xf1   : > { %p17_p7 = scmp.ge.s32.totalorder %s20_s17, 4   ;;  %s949_s13 = smov %s748_s14 }
  0xf2   : > { %s950_s14 = smov %s867_s22  ;;  %s951_s15 = smov %s756_s16 }
  0xf3   : > { %s952_s16 = smov %s954_s8  ;;  %19 = sbr.rel (!%p17_p7) target bundleno = 7 (0x7), region = 89 }
  0xf8   :  { %390 = vsyncpa [#allocation3], 1 }
  0xf9   :  { %392 = vsyncpa [#allocation3 + $0x1], 1 }
  0xfa   :  { %393 = vsyncpa [#allocation6], 1 }
  0xfb   :  { %394 = vsyncpa [#allocation4], 1 }
  0xfc   :  { %396 = vsyncpa [#allocation4 + $0x1], 1 }

// kernel: tpu_custom_call.1
= control target key start
LH: loop header
LB: loop body
LE: loop exit
PB: predicated region body
PF: predicated region fallthrough
CT: control target
= control target key end

     0   :  { %8 = vsyncpa [#allocation3], 0  ;;  %s939_s0 = inlined_call_operand.hbm [shape: f32[16,128], index: 0, kind: input, shape index: {}]   ;;  %s940_s1 = inlined_call_operand.hbm [shape: f32[2,128,128], index: 1, kind: input, shape index: {}]   ;;  %s941_s2 = inlined_call_operand.hbm [shape: f32[2,1,128], index: 2, kind: input, shape index: {}]   ;;  %s942_s3 = inlined_call_operand.hbm [shape: f32[16,128], index: 3, kind: output, shape index: {}]  }
   0x1   :  { %10 = vsyncpa [#allocation3 + $0x1], 0 }
   0x2   :  { %11 = vsyncpa [#allocation6], 0 }
   0x3   :  { %12 = vsyncpa [#allocation4], 0 }
   0x4   :  { %14 = vsyncpa [#allocation4 + $0x1], 0  ;;  %s788_s12 = smov 0   ;;  %s790_s13 = smov 0  }
   0x5   :  { %s792_s14 = smov 0   ;;  %s794_s15 = smov 0  }
   0x6   :  { %s796_s16 = smov 0   ;;  %s798_s17 = smov 0  }
   0x7 LB: > { %s473_s18 = sadd.s32 4294967295, %s760_s17   ;;  %p475_p0 = scmp.ge.s32.totalorder %s760_s17, 1  ;;  %s760_s17 = sphi %s798_s17, %s20_s17   ;;  %s756_s16 = sphi %s796_s16, %s952_s16   ;;  %s752_s15 = sphi %s794_s15, %s951_s15   ;;  %s748_s14 = sphi %s792_s14, %s950_s14   ;;  %s744_s13 = sphi %s790_s13, %s949_s13   ;;  %s740_s12 = sphi %s788_s12, %s948_s12  }
   0x8   : > { %p822_p1 = scmp.eq.s32.totalorder %s473_s18, 0  ;;  %p143_p2 = scmp.lt.s32.totalorder %s760_s17, 3 }
   0x9   : > { %s156_s22 = sshll.u32 %s940_s1, 4  ;;  %s762_s24 = smov [#allocation5]   ;;  %s157_s22 = int_to_ptr.hbm [resolvable:$true] %s156_s22 }
   0xa   : > { %p830_p3 = pnand %p475_p0, %p143_p2  ;;  %s158_s25 = sshll.u32 %s762_s24, 4  ;;  %s159_s25 = int_to_ptr.vmem [resolvable:$true] %s158_s25 }
   0xb   : > { %p478_p6 = scmp.ge.s32.totalorder %s760_s17, 2  ;;  %s171_s28 = sshll.u32 %s941_s2, 4  ;;  %s172_s28 = int_to_ptr.hbm [resolvable:$true] %s171_s28 }
   0xc   : > { %p503_p4 = pneg %p830_p3  ;;  %s763_s29 = smov 128  }
   0xd   : > { %s764_s30 = smov 8   ;;  %s765_s4 = smov [#allocation7]  }
   0xe   : > { %p504_p5 = pnand %p503_p4, %p822_p1  ;;  %s173_s5 = sshll.u32 %s765_s4, 4  ;;  %s174_s5 = int_to_ptr.vmem [resolvable:$true] %s173_s5 }
   0xf   : > { %s766_s6 = smov 16   ;;  %s767_s7 = smov 1  }
  0x10   : > { %506 = dma.hbm_to_vmem [thread:$0]  (!%p504_p5), %s157_s22, 4096, %s159_s25, [#allocation6], %s763_s29, %s763_s29, %s764_s30  }
  0x11   : > { %509 = dma.hbm_to_vmem [thread:$0]  (!%p504_p5), %s172_s28, 32, %s174_s5, [#allocation6], %s766_s6, %s766_s6, %s767_s7  }
  0x12   : > { %s32_s8 = sadd.s32 1, %s756_s16  ;;  %s474_s9 = sadd.s32 4294967294, %s760_s17  }
  0x13   : > { %p34_p7 = scmp.ge.s32.totalorder %s32_s8, 2  ;;  %s39_s10 = sadd.s32 1, %s748_s14 }
  0x14   : > { %p46_p8 = scmp.ne.s32.totalorder %s748_s14, %s744_s13  ;;  %p47_p9 = scmp.eq.s32.totalorder %s760_s17, 0 }
  0x15   : > { %s954_s8 = smov (%p34_p7, %s32_s8), 0  ;;  %p52_p10 = scmp.ne.s32.totalorder %s744_s13, %s740_s12 }
  0x16   : > { %s36_s11 = ssub.s32 %s756_s16, %s954_s8  ;;  %p130_p11 = scmp.eq.s32.totalorder %s473_s18, 1 }
  0x17   : > { %p37_p12 = scmp.eq.s32.totalorder %s36_s11, 0  ;;  %p858_p13 = por %p822_p1, %p52_p10 }
  0x18   : > { %p862_p0 = por %p130_p11, %p46_p8  ;;  %p136_p2 = scmp.eq.s32.totalorder %s474_s9, 1 }
  0x19   : > { %s867_s22 = scalar_select %p37_p12, %s748_s14, %s39_s10  }
  0x1a   : > { %p48_p4 = por %p47_p9, %p46_p8  ;;  %p869_p5 = por %p136_p2, %p52_p10 }
  0x1b   : > { %s187_s25 = sand.u32 1, %s748_s14   ;;  %s480_s18 = sshll.u32 %s756_s16, 3 }
  0x1c   : > { %p520_p7 = scmp.lt.s32.totalorder %s760_s17, 2  ;;  %s479_s26 = sshll.u32 %s187_s25, 3 }
  0x1d   : > { %s195_s29 = scalar_lea.hbm %s939_s0, %s480_s18  ;;  %s191_s4 = scalar_lea.vmem [#allocation2], %s479_s26 }
  0x1e   : > { %s197_s30 = sshll.u32 %s195_s29, 4  ;;  %s199_s5 = sshll.u32 %s191_s4, 4  ;;  %s198_s30 = int_to_ptr.hbm [resolvable:$true] %s197_s30  ;;  %s200_s5 = int_to_ptr.vmem [resolvable:$true] %s199_s5 }
  0x1f   : > { %p511_p11 = pnand %p520_p7, %p48_p4  ;;  %s188_s6 = scalar_lea.sflag [#allocation3], %s187_s25 }
  0x20   : > { %208 = sbr.rel (%p830_p3) target bundleno = 235 (0xeb), region = 32  ;;  %s882_s7 = sand.u32 (!%p830_p3), 1, %s744_s13  }
  0x21   : > { %513 = dma.hbm_to_vmem [thread:$0]  (!%p511_p11), %s198_s30, 128, %s200_s5, %s188_s6  }
  0x22   : > { %s482_s9 = sshll.u32 (!%p830_p3), %s882_s7, 3  ;;  %s211_s10 = scalar_lea.sflag (!%p830_p3), [#allocation3], %s882_s7 }
  0x23   : > { %s888_s11 = scalar_lea.vmem (!%p830_p3), [#allocation2], %s482_s9 }
  0x25   : > { %727 = dma.done.wait (%p858_p13), %s211_s10, 128  }
  0x26   : > { %729 = vsyncadd (%p858_p13), %s211_s10, 4294967168 }
  0x27   : > { %731 = dma.done.wait (%p822_p1), [#allocation6], 4128  }
  0x28   : > { %733 = vsyncadd (%p822_p1), [#allocation6], 4294963168  ;;  %v305_v0 = vld [vmem:[#allocation5 + $0xf8] sm:$0xff]  ;;  %v304_v1 = vld [vmem:[#allocation5 + $0xf0] sm:$0xff]  ;;  %s488_s19 = sshll.u32 %s752_s15, 3  ;;  %s247_s18 = scalar_lea.vmem [#allocation8], %s482_s9 }
  0x29   : > { %311 = vmatpush.msra.mxu1 %v305_v0  ;;  %v303_v2 = vld [vmem:[#allocation5 + $0xe8] sm:$0xff]  ;;  %v302_v3 = vld [vmem:[#allocation5 + $0xe0] sm:$0xff]  ;;  %v264_v4 = vld [vmem:[#allocation5 + $0x78] sm:$0xff]  ;;  %s367_s25 = scalar_lea.hbm %s942_s3, %s488_s19  ;;  %s369_s15 = sshll.u32 %s247_s18, 4  ;;  %s370_s15 = int_to_ptr.vmem [resolvable:$true] %s369_s15 }
  0x2a   : > { %v263_v5 = vld [vmem:[#allocation5 + $0x70] sm:$0xff]  ;;  %269 = vmatpush.msra.mxu0 %v264_v4  ;;  %v301_v6 = vld [vmem:[#allocation5 + $0xd8] sm:$0xff]  ;;  %v262_v7 = vld [vmem:[#allocation5 + $0x68] sm:$0xff]  ;;  %s371_s26 = sshll.u32 %s367_s25, 4  ;;  %s356_s27 = scalar_lea.sflag [#allocation4], %s882_s7  ;;  %s372_s26 = int_to_ptr.hbm [resolvable:$true] %s371_s26 }
  0x2b   : > { %312 = vmatpush.msra.mxu1 %v304_v1  ;;  %v300_v8 = vld [vmem:[#allocation5 + $0xd0] sm:$0xff]  ;;  %v261_v9 = vld [vmem:[#allocation5 + $0x60] sm:$0xff]  ;;  %v299_v10 = vld [vmem:[#allocation5 + $0xc8] sm:$0xff]  ;;  %s688_s28 = sshra.s32 %s372_s26, 4  ;;  %s694_s5 = scalar_lea.hbm %s942_s3, 16  ;;  %s689_s28 = int_to_ptr.hbm [resolvable:$true] %s688_s28 }
  0x2c   : > { %270 = vmatpush.msra.mxu0 %v263_v5  ;;  %v260_v11 = vld [vmem:[#allocation5 + $0x58] sm:$0xff]  ;;  %v298_v12 = vld [vmem:[#allocation5 + $0xc0] sm:$0xff]  ;;  %v259_v13 = vld [vmem:[#allocation5 + $0x50] sm:$0xff]  ;;  %s690_s29 = scalar_lea.hbm %s689_s28, 8  ;;  %p695_p9 = scmp.lt.s32.totalorder %s689_s28, %s942_s3 }
  0x2d   : > { %313 = vmatpush.msra.mxu1 %v303_v2  ;;  %v297_v14 = vld [vmem:[#allocation5 + $0xb8] sm:$0xff]  ;;  %v258_v15 = vld [vmem:[#allocation5 + $0x48] sm:$0xff]  ;;  %v296_v16 = vld [vmem:[#allocation5 + $0xb0] sm:$0xff]  ;;  %p691_p1 = scmp.ne.s32.totalorder %s689_s28, %s690_s29  ;;  %p696_p10 = scmp.lt.s32.totalorder %s694_s5, %s690_s29 }
  0x2e   : > { %271 = vmatpush.msra.mxu0 %v262_v7  ;;  %v257_v17 = vld [vmem:[#allocation5 + $0x40] sm:$0xff]  ;;  %v295_v18 = vld [vmem:[#allocation5 + $0xa8] sm:$0xff]  ;;  %v256_v19 = vld [vmem:[#allocation5 + $0x38] sm:$0xff] }
  0x2f   : > { %314 = vmatpush.msra.mxu1 %v302_v3  ;;  %v294_v20 = vld [vmem:[#allocation5 + $0xa0] sm:$0xff]  ;;  %v255_v21 = vld [vmem:[#allocation5 + $0x30] sm:$0xff]  ;;  %v293_v22 = vld [vmem:[#allocation5 + $0x98] sm:$0xff]  ;;  %p692_p3 = pnand %p691_p1, %p862_p0  ;;  %p697_p12 = por %p696_p10, %p695_p9 }
  0x30   : > { %272 = vmatpush.msra.mxu0 %v261_v9  ;;  %v254_v23 = vld [vmem:[#allocation5 + $0x28] sm:$0xff]  ;;  %v292_v24 = vld [vmem:[#allocation5 + $0x90] sm:$0xff]  ;;  %v253_v25 = vld [vmem:[#allocation5 + $0x20] sm:$0xff] }
  0x31   : > { %315 = vmatpush.msra.mxu1 %v301_v6  ;;  %v291_v26 = vld [vmem:[#allocation5 + $0x88] sm:$0xff]  ;;  %v252_v27 = vld [vmem:[#allocation5 + $0x18] sm:$0xff]  ;;  %v290_v28 = vld [vmem:[#allocation5 + $0x80] sm:$0xff]  ;;  %p693_p8 = pneg %p692_p3 }
  0x32   : > { %273 = vmatpush.msra.mxu0 %v260_v11  ;;  %v251_v29 = vld [vmem:[#allocation5 + $0x10] sm:$0xff]  ;;  %v250_v31 = vld [vmem:[#allocation5 + $0x8] sm:$0xff]  ;;  %v249_v32 = vld [vmem:[#allocation5] sm:$0xff] }
  0x33   : > { %316 = vmatpush.msra.mxu1 %v300_v8  ;;  %v248_v30 = vld [vmem:[%s888_s11] sm:$0xff]  ;;  %v578_v33 = vld [vmem:[#allocation7 + $0x1] ss:$0 sm:$0xff]  ;;  %v579_v39 = vld [vmem:[#allocation7] ss:$0 sm:$0xff]  ;;  %p698_p13 = pnand %p697_p12, %p693_p8 }
  0x34   : > { %274 = vmatpush.msra.mxu0 %v259_v13 }
  0x35   : > { %317 = vmatpush.msra.mxu1 %v299_v10 }
  0x36   : > { %275 = vmatpush.msra.mxu0 %v258_v15 }
  0x37   : > { %318 = vmatpush.msra.mxu1 %v298_v12 }
  0x38   : > { %276 = vmatpush.msra.mxu0 %v257_v17 }
  0x39   : > { %319 = vmatpush.msra.mxu1 %v297_v14 }
  0x3a   : > { %277 = vmatpush.msra.mxu0 %v256_v19 }
  0x3b   : > { %320 = vmatpush.msra.mxu1 %v296_v16 }
  0x3c   : > { %278 = vmatpush.msra.mxu0 %v255_v21 }
  0x3d   : > { %321 = vmatpush.msra.mxu1 %v295_v18 }
  0x3e   : > { %279 = vmatpush.msra.mxu0 %v254_v23 }
  0x3f   : > { %322 = vmatpush.msra.mxu1 %v294_v20 }
  0x40   : > { %280 = vmatpush.msra.mxu0 %v253_v25 }
  0x41   : > { %323 = vmatpush.msra.mxu1 %v293_v22 }
  0x42   : > { %281 = vmatpush.msra.mxu0 %v252_v27 }
  0x43   : > { %324 = vmatpush.msra.mxu1 %v292_v24 }
  0x44   : > { %282 = vmatpush.msra.mxu0 %v251_v29 }
  0x45   : > { %325 = vmatpush.msra.mxu1 %v291_v26 }
  0x46   : > { %283 = vmatpush.msra.mxu0 %v250_v31 }
  0x47   : > { %326 = vmatpush.msra.mxu1 %v290_v28 }
  0x48   : > { %327 = vmatmul.f32.vlgmr.msra.gmra.mxu1 %v248_v30  ;;  %284 = vmatpush.msra.mxu0 %v249_v32 }
  0x49   : > { %285 = vmatmul.f32.vlgmr.msra.gmra.mxu0 %v248_v30 }
  0xc5   : > { %v328_v34 = vpop.f32.mrf.mxu1 }
  0xc6   : > { %v329_v35 = vadd.f32 %v578_v33, %v328_v34  ;;  %v286_v40 = vpop.f32.mrf.mxu0 }
  0xc7   : > { %v287_v41 = vadd.f32 %v579_v39, %v286_v40 }
  0xc8   : > { %v486_v36 = vmul.f32 -1.442695, %v329_v35 }
  0xc9   : > { %v331_v45 = vmax.f32 %v287_v41, 0.0 }
  0xca   : > { %580 = vpow2.f32 %v486_v36 }
  0xcb   : > { %v351_v50 = vsub.f32 %v331_v45, %v248_v30 }
  0xd0   : > { %v581_v37 = vpop.eup %580 }
  0xd1   : > { %v335_v38 = vadd.f32 1.0, %v581_v37 }
  0xd3   : > { %582 = vrcp.f32 %v335_v38  ;;  %v347_v46 = vand.u32 2147483648, %v335_v38  ;;  %v345_v48 = vand.u32 2147483647, %v335_v38  ;;  %vm341_vm1 = vweird.f32 %v335_v38 }
  0xd5   : > { %v348_v51 = vor.u32 1.1754944e-38, %v347_v46  ;;  %vm346_vm3 = vcmp.eq.f32.partialorder %v345_v48, 8.507059e+37 }
  0xd9   : > { %v583_v42 = vpop.eup %582 }
  0xda   : > { %v337_v43 = vmul.f32 %v583_v42, %v335_v38  ;;  %vm342_vm0 = vweird.f32 %v583_v42 }
  0xdb   : > { %vm343_vm2 = vmor %vm341_vm1, %vm342_vm0 }
  0xdc   : > { %v338_v44 = vsub.f32 1.0, %v337_v43 }
  0xde   : > { %v339_v47 = vmul.f32 %v583_v42, %v338_v44 }
  0xe0   : > { %v340_v49 = vadd.f32 %v583_v42, %v339_v47 }
  0xe2   : > { %v344_v52 = vsel %vm343_vm2, %v583_v42, %v340_v49 }
  0xe3   : > { %v349_v53 = vsel %vm346_vm3, %v348_v51, %v344_v52 }
  0xe4   : > { %v352_v54 = vmul.f32 %v351_v50, %v349_v53 }
  0xe6   : > { %v353_v55 = vadd.f32 %v352_v54, %v248_v30 }
  0xe8   : > { %354 = vst [vmem:[%s247_s18] sm:$0xff] %v353_v55 }
  0xe9   : > { %701 = shalt.err (!%p698_p13)
}
  0xea   : > { %501 = dma.vmem_to_hbm [thread:$0]  (%p862_p0), %s370_s15, 128, %s372_s26, %s356_s27  }
  0xeb PF: > { %s383_s7 = sand.u32 1, %s740_s12   ;;  %p515_p2 = pnand %p478_p6, %p869_p5 }
  0xec   : > { %s384_s10 = scalar_lea.sflag [#allocation4], %s383_s7 }
  0xed   : > { %p516_p4 = pneg %p515_p2 }
  0xef   : > { %735 = dma.done.wait (%p516_p4), %s384_s10, 128  }
  0xf0   : > { %737 = vsyncadd (%p516_p4), %s384_s10, 4294967168  ;;  %s20_s17 = sadd.s32 1, %s760_s17   ;;  %s948_s12 = smov %s744_s13 }
  0xf1   : > { %p17_p7 = scmp.ge.s32.totalorder %s20_s17, 4   ;;  %s949_s13 = smov %s748_s14 }
  0xf2   : > { %s950_s14 = smov %s867_s22  ;;  %s951_s15 = smov %s756_s16 }
  0xf3   : > { %s952_s16 = smov %s954_s8  ;;  %19 = sbr.rel (!%p17_p7) target bundleno = 7 (0x7), region = 89 }
  0xf8   :  { %390 = vsyncpa [#allocation3], 1 }
  0xf9   :  { %392 = vsyncpa [#allocation3 + $0x1], 1 }
  0xfa   :  { %393 = vsyncpa [#allocation6], 1 }
  0xfb   :  { %394 = vsyncpa [#allocation4], 1 }
  0xfc   :  { %396 = vsyncpa [#allocation4 + $0x1], 1 }

</bundles_post_ra>
